<compile_context>
chip_gen: v6e
topology: v6e:2x2x1
jax: 0.10.0
libtpu: 0.0.40
codegen_flags: <defaults>
</compile_context>

<pallas_src>
import functools

import jax
import jax.numpy as jnp
from jax.experimental import pallas as pl
from jax.experimental.pallas import tpu as pltpu

LANE = 128
SUBLANE_BF16 = 16  # native bf16 sublane tile


def _round_up(n, m):
    return ((n + m - 1) // m) * m


def _cdiv(a, b):
    return (a + b - 1) // b


def generator_kernel(x_ref, w1_ref, b1_ref, w2_ref, b2_ref, w3_ref, b3_ref, o_ref):
    # x arrives as unpadded f32; cast to bf16 in-kernel (VPU filler, hidden under DMA).
    x = x_ref[...].astype(jnp.bfloat16)
    # fc1: bf16 MXU operands, f32 accumulate; bias + ReLU in f32.
    h1 = jnp.dot(x, w1_ref[...], preferred_element_type=jnp.float32)
    h1 = jnp.maximum(h1 + b1_ref[...], 0.0)
    # fc2
    h2 = jnp.dot(h1.astype(jnp.bfloat16), w2_ref[...], preferred_element_type=jnp.float32)
    h2 = jnp.maximum(h2 + b2_ref[...], 0.0)
    # fc3 + tanh (EUP, f32); output last dim is the real embedding_size (no padded cols written).
    h3 = jnp.dot(h2.astype(jnp.bfloat16), w3_ref[...], preferred_element_type=jnp.float32)
    o_ref[...] = jnp.tanh(h3 + b3_ref[...]).astype(o_ref.dtype)


def init_params(key, latent_dim, conv_dim, embedding_size):
    """Unpadded f32 parameters. Weights stored [in, out] (transpose of nn.Linear's [out, in])."""
    h1 = conv_dim * 4
    h2 = conv_dim * 8
    k1, k2, k3, k4, k5, k6 = jax.random.split(key, 6)
    s = 0.1
    return {
        "w1": s * jax.random.normal(k1, (latent_dim, h1), jnp.float32),
        "b1": s * jax.random.normal(k2, (1, h1), jnp.float32),
        "w2": s * jax.random.normal(k3, (h1, h2), jnp.float32),
        "b2": s * jax.random.normal(k4, (1, h2), jnp.float32),
        "w3": s * jax.random.normal(k5, (h2, embedding_size), jnp.float32),
        "b3": s * jax.random.normal(k6, (1, embedding_size), jnp.float32),
    }


def pack_params(params):
    """Zero-pad only the *hidden* dims (conv_dim*4, conv_dim*8) to the 128-lane width and cast
    weights to bf16 for the MXU. The latent (K of fc1) and embedding (N of fc3) dims stay
    unpadded so x and the output carry no padded HBM bytes. Padded hidden cols are zero through
    bias + ReLU, so they contribute nothing downstream. Biases stay f32."""
    h1 = params["w1"].shape[1]
    h2 = params["w2"].shape[1]
    h1p = _round_up(h1, LANE)
    h2p = _round_up(h2, LANE)
    return {
        "w1": jnp.pad(params["w1"], ((0, 0), (0, h1p - h1))).astype(jnp.bfloat16),
        "b1": jnp.pad(params["b1"], ((0, 0), (0, h1p - h1))),
        "w2": jnp.pad(params["w2"], ((0, h1p - h1), (0, h2p - h2))).astype(jnp.bfloat16),
        "b2": jnp.pad(params["b2"], ((0, 0), (0, h2p - h2))),
        "w3": jnp.pad(params["w3"], ((0, h2p - h2), (0, 0))).astype(jnp.bfloat16),
        "b3": params["b3"],  # (1, embedding_size), f32, unpadded
    }


def _select_tiles(B, tb_max=1024):
    """Pick (tb, Bp): tb a multiple of 16 (bf16 sublane tile), Bp = n_tiles * tb with small
    overshoot, and >= 2 grid steps whenever the batch allows so v7x's two TensorCores both
    get work (no-op on v5e/v6e)."""
    b16 = _round_up(max(B, 1), SUBLANE_BF16)
    n_tiles = _cdiv(b16, tb_max)
    if n_tiles < 2 and b16 >= 2 * SUBLANE_BF16:
        n_tiles = 2
    tb = _round_up(_cdiv(b16, n_tiles), SUBLANE_BF16)
    return tb, n_tiles * tb


def generator_forward(x, packed, embedding_size, *, tb_max=1024):
    """x: [B, latent_dim] f32 (unpadded). packed: output of pack_params.
    Returns [B, embedding_size] f32."""
    B, latent = x.shape
    h1p = packed["w1"].shape[1]
    h2p = packed["w2"].shape[1]

    tb, Bp = _select_tiles(B, tb_max)

    # Only the batch rows are (cheaply) zero-padded; no lane padding, no wrapper-side cast.
    xp = x if Bp == B else jnp.pad(x, ((0, Bp - B), (0, 0)))

    const = lambda i: (0, 0)
    out = pl.pallas_call(
        generator_kernel,
        out_shape=jax.ShapeDtypeStruct((Bp, embedding_size), jnp.float32),
        grid=(Bp // tb,),
        in_specs=[
            pl.BlockSpec((tb, latent), lambda i: (i, 0)),        # x: batch-tiled, unpadded f32
            pl.BlockSpec((latent, h1p), const),                  # weights/biases VMEM-resident
            pl.BlockSpec((1, h1p), const),
            pl.BlockSpec((h1p, h2p), const),
            pl.BlockSpec((1, h2p), const),
            pl.BlockSpec((h2p, embedding_size), const),
            pl.BlockSpec((1, embedding_size), const),
        ],
        out_specs=pl.BlockSpec((tb, embedding_size), lambda i: (i, 0)),
        compiler_params=pltpu.CompilerParams(
            dimension_semantics=("parallel",),                   # shard batch across TCs (v7x)
        ),
    )(xp, packed["w1"], packed["b1"], packed["w2"], packed["b2"],
      packed["w3"], packed["b3"])

    return out if Bp == B else out[:B]


def generator_ref(x, params):
    """Pure-JAX f32 reference for correctness checking."""
    h1 = jnp.maximum(x @ params["w1"] + params["b1"], 0.0)
    h2 = jnp.maximum(h1 @ params["w2"] + params["b2"], 0.0)
    return jnp.tanh(h2 @ params["w3"] + params["b3"])


if __name__ == "__main__":
    # Small shapes consistent with the module's forward pass.
    batch = 8
    latent_dim = 32
    conv_dim = 16            # -> hidden dims 64 and 128
    embedding_size = 32

    key = jax.random.PRNGKey(0)
    kx, kp = jax.random.split(key)
    x = jax.random.normal(kx, (batch, latent_dim), jnp.float32)
    params = init_params(kp, latent_dim, conv_dim, embedding_size)
    packed = pack_params(params)

    fwd = jax.jit(functools.partial(generator_forward, embedding_size=embedding_size))
    out = jax.block_until_ready(fwd(x, packed))

    ref = generator_ref(x, params)
    assert out.shape == (batch, embedding_size), out.shape
    # bf16 MXU operands -> loosen tolerance vs the f32 reference.
    assert jnp.allclose(out, ref, atol=2e-2, rtol=0.0), float(jnp.max(jnp.abs(out - ref)))

    print("KERNEL_OK")
</pallas_src>

<mosaic_0001>
module attributes {stable_mosaic.version = 11 : i64} {
  func.func @generator_kernel(%arg0: i32, %arg1: memref<16x32xf32, #tpu.memory_space<vmem>>, %arg2: memref<32x128xbf16, #tpu.memory_space<vmem>>, %arg3: memref<1x128xf32, #tpu.memory_space<vmem>>, %arg4: memref<128x128xbf16, #tpu.memory_space<vmem>>, %arg5: memref<1x128xf32, #tpu.memory_space<vmem>>, %arg6: memref<128x32xbf16, #tpu.memory_space<vmem>>, %arg7: memref<1x32xf32, #tpu.memory_space<vmem>>, %arg8: memref<16x32xf32, #tpu.memory_space<vmem>>) attributes {dimension_semantics = [#tpu.dimension_semantics<parallel>], iteration_bounds = array<i64: 1>, scalar_prefetch = 0 : i64, scratch_operands = 0 : i64, tpu.core_type = #tpu.core_type<tc>, window_params = [{transform_indices = @transform_0, window_bounds = array<i64: 16, 32>}, {pipeline_mode = #tpu.pipeline_mode<synchronous>, transform_indices = @transform_1, window_bounds = array<i64: 32, 128>}, {pipeline_mode = #tpu.pipeline_mode<synchronous>, transform_indices = @transform_2, window_bounds = array<i64: 1, 128>}, {pipeline_mode = #tpu.pipeline_mode<synchronous>, transform_indices = @transform_3, window_bounds = array<i64: 128, 128>}, {pipeline_mode = #tpu.pipeline_mode<synchronous>, transform_indices = @transform_4, window_bounds = array<i64: 1, 128>}, {pipeline_mode = #tpu.pipeline_mode<synchronous>, transform_indices = @transform_5, window_bounds = array<i64: 128, 32>}, {pipeline_mode = #tpu.pipeline_mode<synchronous>, transform_indices = @transform_6, window_bounds = array<i64: 1, 32>}, {transform_indices = @transform_7, window_bounds = array<i64: 16, 32>}]} {
    %c0 = arith.constant 0 : index
    %c0_0 = arith.constant 0 : index
    %0 = vector.load %arg1[%c0, %c0_0] : memref<16x32xf32, #tpu.memory_space<vmem>>, vector<16x32xf32>
    %1 = arith.truncf %0 : vector<16x32xf32> to vector<16x32xbf16>
    %c0_1 = arith.constant 0 : index
    %c0_2 = arith.constant 0 : index
    %2 = vector.load %arg2[%c0_1, %c0_2] : memref<32x128xbf16, #tpu.memory_space<vmem>>, vector<32x128xbf16>
    %cst = arith.constant dense<0.000000e+00> : vector<16x128xf32>
    %3 = tpu.matmul %1, %2, %cst {dimension_numbers = #tpu.dot_dimension_numbers<[1], [0], [0], [1], [0, 0, 1, 1], [], []>} : vector<16x32xbf16>, vector<32x128xbf16>, vector<16x128xf32> -> vector<16x128xf32>
    %c0_3 = arith.constant 0 : index
    %c0_4 = arith.constant 0 : index
    %4 = vector.load %arg3[%c0_3, %c0_4] : memref<1x128xf32, #tpu.memory_space<vmem>>, vector<1x128xf32>
    %5 = vector.broadcast %4 : vector<1x128xf32> to vector<16x128xf32>
    %6 = arith.addf %3, %5 : vector<16x128xf32>
    %cst_5 = arith.constant 0.000000e+00 : f32
    %7 = vector.broadcast %cst_5 : f32 to vector<16x128xf32>
    %8 = arith.maximumf %6, %7 : vector<16x128xf32>
    %9 = arith.truncf %8 : vector<16x128xf32> to vector<16x128xbf16>
    %c0_6 = arith.constant 0 : index
    %c0_7 = arith.constant 0 : index
    %10 = vector.load %arg4[%c0_6, %c0_7] : memref<128x128xbf16, #tpu.memory_space<vmem>>, vector<128x128xbf16>
    %cst_8 = arith.constant dense<0.000000e+00> : vector<16x128xf32>
    %11 = tpu.matmul %9, %10, %cst_8 {dimension_numbers = #tpu.dot_dimension_numbers<[1], [0], [0], [1], [0, 0, 1, 1], [], []>} : vector<16x128xbf16>, vector<128x128xbf16>, vector<16x128xf32> -> vector<16x128xf32>
    %c0_9 = arith.constant 0 : index
    %c0_10 = arith.constant 0 : index
    %12 = vector.load %arg5[%c0_9, %c0_10] : memref<1x128xf32, #tpu.memory_space<vmem>>, vector<1x128xf32>
    %13 = vector.broadcast %12 : vector<1x128xf32> to vector<16x128xf32>
    %14 = arith.addf %11, %13 : vector<16x128xf32>
    %cst_11 = arith.constant 0.000000e+00 : f32
    %15 = vector.broadcast %cst_11 : f32 to vector<16x128xf32>
    %16 = arith.maximumf %14, %15 : vector<16x128xf32>
    %17 = arith.truncf %16 : vector<16x128xf32> to vector<16x128xbf16>
    %c0_12 = arith.constant 0 : index
    %c0_13 = arith.constant 0 : index
    %18 = vector.load %arg6[%c0_12, %c0_13] : memref<128x32xbf16, #tpu.memory_space<vmem>>, vector<128x32xbf16>
    %cst_14 = arith.constant dense<0.000000e+00> : vector<16x32xf32>
    %19 = tpu.matmul %17, %18, %cst_14 {dimension_numbers = #tpu.dot_dimension_numbers<[1], [0], [0], [1], [0, 0, 1, 1], [], []>} : vector<16x128xbf16>, vector<128x32xbf16>, vector<16x32xf32> -> vector<16x32xf32>
    %c0_15 = arith.constant 0 : index
    %c0_16 = arith.constant 0 : index
    %20 = vector.load %arg7[%c0_15, %c0_16] : memref<1x32xf32, #tpu.memory_space<vmem>>, vector<1x32xf32>
    %21 = vector.broadcast %20 : vector<1x32xf32> to vector<16x32xf32>
    %22 = arith.addf %19, %21 : vector<16x32xf32>
    %23 = math.tanh %22 : vector<16x32xf32>
    %c0_17 = arith.constant 0 : index
    %c0_18 = arith.constant 0 : index
    %24 = vector.load %arg8[%c0_17, %c0_18] : memref<16x32xf32, #tpu.memory_space<vmem>>, vector<16x32xf32>
    tpu.vector_store %arg8[%c0_17, %c0_18], %23 {strides = array<i32>} : memref<16x32xf32, #tpu.memory_space<vmem>>, vector<16x32xf32>,
    return
  }
  func.func @transform_0(%arg0: i32) -> (i32, i32) {
    %c0_i32 = arith.constant 0 : i32
    %c0_i32_0 = arith.constant 0 : i32
    return %arg0, %c0_i32 : i32, i32
  }
  func.func @transform_1(%arg0: i32) -> (i32, i32) {
    %c0_i32 = arith.constant 0 : i32
    %c0_i32_0 = arith.constant 0 : i32
    %c0_i32_1 = arith.constant 0 : i32
    return %c0_i32, %c0_i32_0 : i32, i32
  }
  func.func @transform_2(%arg0: i32) -> (i32, i32) {
    %c0_i32 = arith.constant 0 : i32
    %c0_i32_0 = arith.constant 0 : i32
    %c0_i32_1 = arith.constant 0 : i32
    return %c0_i32, %c0_i32_0 : i32, i32
  }
  func.func @transform_3(%arg0: i32) -> (i32, i32) {
    %c0_i32 = arith.constant 0 : i32
    %c0_i32_0 = arith.constant 0 : i32
    %c0_i32_1 = arith.constant 0 : i32
    return %c0_i32, %c0_i32_0 : i32, i32
  }
  func.func @transform_4(%arg0: i32) -> (i32, i32) {
    %c0_i32 = arith.constant 0 : i32
    %c0_i32_0 = arith.constant 0 : i32
    %c0_i32_1 = arith.constant 0 : i32
    return %c0_i32, %c0_i32_0 : i32, i32
  }
  func.func @transform_5(%arg0: i32) -> (i32, i32) {
    %c0_i32 = arith.constant 0 : i32
    %c0_i32_0 = arith.constant 0 : i32
    %c0_i32_1 = arith.constant 0 : i32
    return %c0_i32, %c0_i32_0 : i32, i32
  }
  func.func @transform_6(%arg0: i32) -> (i32, i32) {
    %c0_i32 = arith.constant 0 : i32
    %c0_i32_0 = arith.constant 0 : i32
    %c0_i32_1 = arith.constant 0 : i32
    return %c0_i32, %c0_i32_0 : i32, i32
  }
  func.func @transform_7(%arg0: i32) -> (i32, i32) {
    %c0_i32 = arith.constant 0 : i32
    %c0_i32_0 = arith.constant 0 : i32
    return %arg0, %c0_i32 : i32, i32
  }
}

</mosaic_0001>

<bundles_post_ra>
// kernel: generator_forward.1
= control target key start
LH: loop header
LB: loop body
LE: loop exit
PB: predicated region body
PF: predicated region fallthrough
CT: control target
= control target key end

     0   :  { %v451_v0 = vmov 0.0   ;;  %vm452_vm0 = vmmov 0   ;;  %vm53_vm1 = vcmask 261120   ;;  %s595_s1 = inlined_call_operand.vmem [shape: bf16[32,128], index: 1, kind: input, shape index: {}]   ;;  %s596_s0 = inlined_call_operand.vmem [shape: f32[16,32], index: 0, kind: input, shape index: {}]   ;;  %s597_s3 = inlined_call_operand.vmem [shape: bf16[128,128], index: 3, kind: input, shape index: {}]   ;;  %s598_s5 = inlined_call_operand.vmem [shape: bf16[128,32], index: 5, kind: input, shape index: {}]   ;;  %s599_s2 = inlined_call_operand.vmem [shape: f32[1,128], index: 2, kind: input, shape index: {}]   ;;  %s600_s4 = inlined_call_operand.vmem [shape: f32[1,128], index: 4, kind: input, shape index: {}]   ;;  %s601_s6 = inlined_call_operand.vmem [shape: f32[1,32], index: 6, kind: input, shape index: {}]   ;;  %s602_s7 = inlined_call_operand.vmem [shape: f32[16,32], index: 7, kind: output, shape index: {}]  }
   0x1   :  { %379 = vmatprep.subr.bf16.mxu0 %v451_v0  ;;  %v429_v1 = vld [vmem:[%s595_s1 + $0x8] sm:$0xff]   ;;  %383 = vmatprep.mubr.msk.bf16.mxu0 %vm452_vm0, %v451_v0  ;;  %v430_v2 = vld [vmem:[%s595_s1] sm:$0xff]   ;;  %v431_v5 = vld [vmem:[%s597_s3 + $0x38] sm:$0xff]  }
   0x2   :  { %387 = vmatprep.subr.bf16.mxu1 %v451_v0  ;;  %403 = vmatprep.mubr.msk.bf16.mxu1 %vm452_vm0, %v451_v0  ;;  %v27_v3 = vld [vmem:[%s596_s0] sm:$0xff]  ;;  %v28_v4 = vld [vmem:[%s596_s0 + $0x8] sm:$0xff]  ;;  %v432_v7 = vld [vmem:[%s597_s3 + $0x30] sm:$0xff]  }
   0x3   :  { %380 = vmatpush3.bf16.msra.mxu0 %v429_v1  ;;  %v29_v6 = vpack.c.bf16 %v28_v4, %v27_v3  ;;  %388 = vmatpush3.bf16.msra.mxu1 %v431_v5  ;;  %v433_v8 = vld [vmem:[%s597_s3 + $0x28] sm:$0xff]   ;;  %v434_v9 = vld [vmem:[%s597_s3 + $0x20] sm:$0xff]   ;;  %v435_v10 = vld [vmem:[%s597_s3 + $0x18] sm:$0xff]  }
   0x4   :  { %381 = vmatprep.subr.bf16.mxu0 %v451_v0  ;;  %389 = vmatprep.subr.bf16.mxu1 %v451_v0  ;;  %v436_v11 = vld [vmem:[%s597_s3 + $0x10] sm:$0xff]   ;;  %v437_v12 = vld [vmem:[%s597_s3 + $0x8] sm:$0xff]   ;;  %v438_v13 = vld [vmem:[%s597_s3] sm:$0xff]  }
   0x5   :  { %v439_v14 = vld [vmem:[%s598_s5 + $0x38] sm:$0xff]   ;;  %v440_v15 = vld [vmem:[%s598_s5 + $0x30] sm:$0xff]   ;;  %v441_v16 = vld [vmem:[%s598_s5 + $0x28] sm:$0xff]  }
   0x6   :  { %v442_v17 = vld [vmem:[%s598_s5 + $0x20] sm:$0xff]   ;;  %v443_v18 = vld [vmem:[%s598_s5 + $0x18] sm:$0xff]   ;;  %v444_v29 = vld [vmem:[%s598_s5 + $0x10] sm:$0xff]  }
   0x7   :  { %382 = vmatpush3.bf16.msra.mxu0 %v430_v2  ;;  %390 = vmatpush3.bf16.msra.mxu1 %v432_v7  ;;  %v336_v19 = vld [vmem:[%s599_s2] ss:$0 sm:$0xff]  ;;  %v445_v30 = vld [vmem:[%s598_s5 + $0x8] sm:$0xff]  }
   0x8   :  { %407 = vmatprep.subr.bf16.mxu0 %v451_v0  ;;  %391 = vmatprep.subr.bf16.mxu1 %v451_v0  ;;  %v446_v31 = vld [vmem:[%s598_s5] sm:$0xff]  }
   0x9   :  { %v340_v32 = vld [vmem:[%s600_s4] ss:$0 sm:$0xff] }
   0xa   :  { %384 = vmatmul.mubr.msk.bf16.vlgmr.msra.gmra.mxu0 %vm53_vm1, %v29_v6  ;;  %v349_v42 = vld [vmem:[%s601_s6] ss:$0 sm:$0xff] }
   0xb   :  { %423 = vmatprep.mubr.msk.bf16.mxu0 %vm452_vm0, %v451_v0  ;;  %392 = vmatpush3.bf16.msra.mxu1 %v433_v8 }
   0xc   :  { %393 = vmatprep.subr.bf16.mxu1 %v451_v0  ;;  %408 = vmatpush3.bf16.msra.mxu0 %v439_v14 }
   0xd   :  { %409 = vmatprep.subr.bf16.mxu0 %v451_v0 }
   0xf   :  { %394 = vmatpush3.bf16.msra.mxu1 %v434_v9 }
  0x10   :  { %395 = vmatprep.subr.bf16.mxu1 %v451_v0  ;;  %410 = vmatpush3.bf16.msra.mxu0 %v440_v15 }
  0x11   :  { %411 = vmatprep.subr.bf16.mxu0 %v451_v0 }
  0x13   :  { %396 = vmatpush3.bf16.msra.mxu1 %v435_v10 }
  0x14   :  { %397 = vmatprep.subr.bf16.mxu1 %v451_v0  ;;  %412 = vmatpush3.bf16.msra.mxu0 %v441_v16 }
  0x15   :  { %413 = vmatprep.subr.bf16.mxu0 %v451_v0 }
  0x17   :  { %398 = vmatpush3.bf16.msra.mxu1 %v436_v11 }
  0x18   :  { %399 = vmatprep.subr.bf16.mxu1 %v451_v0  ;;  %414 = vmatpush3.bf16.msra.mxu0 %v442_v17 }
  0x19   :  { %415 = vmatprep.subr.bf16.mxu0 %v451_v0 }
  0x1b   :  { %400 = vmatpush3.bf16.msra.mxu1 %v437_v12 }
  0x1c   :  { %401 = vmatprep.subr.bf16.mxu1 %v451_v0  ;;  %416 = vmatpush3.bf16.msra.mxu0 %v443_v18 }
  0x1d   :  { %417 = vmatprep.subr.bf16.mxu0 %v451_v0 }
  0x1f   :  { %402 = vmatpush3.bf16.msra.mxu1 %v438_v13 }
  0x20   :  { %418 = vmatpush3.bf16.msra.mxu0 %v444_v29 }
  0x21   :  { %419 = vmatprep.subr.bf16.mxu0 %v451_v0 }
  0x24   :  { %420 = vmatpush3.bf16.msra.mxu0 %v445_v30 }
  0x25   :  { %421 = vmatprep.subr.bf16.mxu0 %v451_v0 }
  0x28   :  { %422 = vmatpush3.bf16.msra.mxu0 %v446_v31 }
  0xca   :  { %v91_v20 = vpop.f32.mrf.mxu0 }
  0xcb   :  { %v92_v22 = vadd.f32 %v336_v19, %v91_v20 }
  0xcc   :  { %v385_v21 = vpop.f32.mrf.mxu0 }
  0xcd   :  { %v98_v26 = vmax.f32 %v92_v22, 0.0 }
  0xce   :  { %v94_v23 = vpop.f32.mrf.mxu0 }
  0xcf   :  { %v95_v24 = vadd.f32 %v336_v19, %v94_v23 }
  0xd0   :  { %v386_v25 = vpop.f32.mrf.mxu0 }
  0xd1   :  { %v99_v27 = vmax.f32 %v95_v24, 0.0 }
  0xd3   :  { %v100_v28 = vpack.c.bf16 %v99_v27, %v98_v26 }
  0xd5   :  { %404 = vmatmul.mubr.bf16.vlgmr.msra.gmra.mxu1 %v100_v28 }
 0x195   :  { %v206_v33 = vpop.f32.mrf.mxu1 }
 0x196   :  { %v207_v35 = vadd.f32 %v340_v32, %v206_v33 }
 0x197   :  { %v405_v34 = vpop.f32.mrf.mxu1 }
 0x198   :  { %v213_v39 = vmax.f32 %v207_v35, 0.0 }
 0x199   :  { %v209_v36 = vpop.f32.mrf.mxu1 }
 0x19a   :  { %v210_v37 = vadd.f32 %v340_v32, %v209_v36 }
 0x19b   :  { %v406_v38 = vpop.f32.mrf.mxu1 }
 0x19c   :  { %v214_v40 = vmax.f32 %v210_v37, 0.0 }
 0x19e   :  { %v215_v41 = vpack.c.bf16 %v214_v40, %v213_v39 }
 0x1a0   :  { %424 = vmatmul.mubr.bf16.vlgmr.msra.gmra.mxu0 %v215_v41 }
 0x260   :  { %v321_v43 = vpop.f32.mrf.mxu0 }
 0x261   :  { %v322_v44 = vadd.f32 %v349_v42, %v321_v43 }
 0x262   :  { %v425_v45 = vpop.f32.mrf.mxu0 }
 0x263   :  { %447 = vtanh.f32 %v322_v44 }
 0x264   :  { %v324_v46 = vpop.f32.mrf.mxu0 }
 0x265   :  { %v325_v47 = vadd.f32 %v349_v42, %v324_v46 }
 0x266   :  { %v426_v48 = vpop.f32.mrf.mxu0 }
 0x267   :  { %449 = vtanh.f32 %v325_v47 }
 0x270   :  { %v448_v49 = vpop.eup %447 }
 0x271   :  { %330 = vst.msk [vmem:[%s602_s7] sm:$0xff] %vm53_vm1, %v448_v49 }
 0x274   :  { %v450_v50 = vpop.eup %449 }
 0x275   :  { %331 = vst.msk [vmem:[%s602_s7 + $0x8] sm:$0xff] %vm53_vm1, %v450_v50 }

</bundles_post_ra>
